<compile_context>
chip_gen: v5e
topology: v5e:2x2
jax: 0.10.0
libtpu: 0.0.40
codegen_flags: <defaults>
</compile_context>

<pallas_src>
import jax
import jax.numpy as jnp
from jax.experimental import pallas as pl
from jax.experimental.pallas import tpu as pltpu

LANE = 128     # TPU lane width: output feature dim is padded to a multiple of this
TILE_B = 128   # batch tile once B is large enough to warrant a grid


def qnetwork_kernel(x_ref, w1_ref, b1_ref, w2_ref, b2_ref, out_ref):
    # fc1: (B, In)bf16 @ (In, H)bf16 -> f32 accumulate on the MXU
    h = jnp.dot(x_ref[...], w1_ref[...], preferred_element_type=jnp.float32)
    h = jnp.maximum(h + b1_ref[...], 0.0)          # bias + ReLU in f32 (VPU)
    # fc2: (B, H)bf16 @ (H, Out_pad)bf16 -> f32 accumulate on the MXU
    y = jnp.dot(h.astype(w2_ref.dtype), w2_ref[...],
                preferred_element_type=jnp.float32)
    out_ref[...] = (y + b2_ref[...]).astype(out_ref.dtype)


def qnetwork_forward(x, w1, b1, w2, b2):
    """x: (B, In) f32; w1: (In, H); b1: (H,)/(1,H); w2: (H, Out); b2: (Out,)/(1,Out)."""
    B, in_size = x.shape
    hidden = w1.shape[1]
    out_size = w2.shape[1]

    # Lane-dense output: pad the (tiny) output feature dim up to 128 lanes.
    out_pad = pl.cdiv(out_size, LANE) * LANE

    # Biases as (1, N) f32 rows (broadcast over batch inside the kernel).
    b1r = jnp.asarray(b1, jnp.float32).reshape(1, hidden)
    b2r = jnp.pad(jnp.asarray(b2, jnp.float32).reshape(1, out_size),
                  ((0, 0), (0, out_pad - out_size)))

    # bf16 inputs / weights; accumulation stays f32 in the kernel.
    x_bf = x.astype(jnp.bfloat16)
    w1_bf = w1.astype(jnp.bfloat16)
    w2_bf = jnp.pad(w2, ((0, 0), (0, out_pad - out_size))).astype(jnp.bfloat16)

    if B <= TILE_B:
        # Single block, no grid: whole operands resident in VMEM, one fused pass.
        out = pl.pallas_call(
            qnetwork_kernel,
            out_shape=jax.ShapeDtypeStruct((B, out_pad), jnp.float32),
        )(x_bf, w1_bf, b1r, w2_bf, b2r)
    else:
        # Batch-tiled path: parallel grid over batch (2x on v7x dual-TC, no-op
        # on v5e/v6e). Weights/biases use constant index_maps so they stay
        # VMEM-resident across batch blocks.
        Bp = pl.cdiv(B, TILE_B) * TILE_B
        if Bp != B:
            x_bf = jnp.pad(x_bf, ((0, Bp - B), (0, 0)))
        out = pl.pallas_call(
            qnetwork_kernel,
            out_shape=jax.ShapeDtypeStruct((Bp, out_pad), jnp.float32),
            grid=(Bp // TILE_B,),
            in_specs=[
                pl.BlockSpec((TILE_B, in_size), lambda b: (b, 0)),
                pl.BlockSpec((in_size, hidden), lambda b: (0, 0)),
                pl.BlockSpec((1, hidden), lambda b: (0, 0)),
                pl.BlockSpec((hidden, out_pad), lambda b: (0, 0)),
                pl.BlockSpec((1, out_pad), lambda b: (0, 0)),
            ],
            out_specs=pl.BlockSpec((TILE_B, out_pad), lambda b: (b, 0)),
            compiler_params=pltpu.CompilerParams(
                dimension_semantics=("parallel",)),
        )(x_bf, w1_bf, b1r, w2_bf, b2r)
        out = out[:B]

    return out[:, :out_size]


def reference_forward(x, w1, b1, w2, b2):
    h = jnp.maximum(x @ w1 + b1.reshape(1, -1), 0.0)
    return h @ w2 + b2.reshape(1, -1)


if __name__ == "__main__":
    # Shapes consistent with QNetwork(input_size, hidden_size, output_size)
    batch, input_size, hidden_size, output_size = 8, 16, 32, 4

    key = jax.random.PRNGKey(0)
    kx, k1, k2, k3, k4, kx2 = jax.random.split(key, 6)

    # PyTorch-Linear-like uniform init, stored transposed: (in, out).
    bound1 = 1.0 / (input_size ** 0.5)
    bound2 = 1.0 / (hidden_size ** 0.5)
    w1 = jax.random.uniform(k1, (input_size, hidden_size), jnp.float32,
                            -bound1, bound1)
    b1 = jax.random.uniform(k2, (1, hidden_size), jnp.float32, -bound1, bound1)
    w2 = jax.random.uniform(k3, (hidden_size, output_size), jnp.float32,
                            -bound2, bound2)
    b2 = jax.random.uniform(k4, (1, output_size), jnp.float32, -bound2, bound2)

    # --- small batch: single-block, no-grid path ---
    x = jax.random.normal(kx, (batch, input_size), jnp.float32)
    out = jax.block_until_ready(qnetwork_forward(x, w1, b1, w2, b2))
    ref = reference_forward(x, w1, b1, w2, b2)
    assert out.shape == (batch, output_size)
    # bf16 inputs/weights -> relaxed tolerance vs. f32 reference
    assert jnp.allclose(out, ref, atol=5e-2, rtol=5e-2)

    # --- large batch: exercises the batch-tiled ("parallel") grid path ---
    big_batch = 2 * TILE_B
    xb = jax.random.normal(kx2, (big_batch, input_size), jnp.float32)
    outb = jax.block_until_ready(qnetwork_forward(xb, w1, b1, w2, b2))
    refb = reference_forward(xb, w1, b1, w2, b2)
    assert outb.shape == (big_batch, output_size)
    assert jnp.allclose(outb, refb, atol=5e-2, rtol=5e-2)

    print("KERNEL_OK")
</pallas_src>

<mosaic_0001>
module attributes {stable_mosaic.version = 11 : i64} {
  func.func @qnetwork_kernel(%arg0: memref<8x16xbf16, #tpu.memory_space<vmem>>, %arg1: memref<16x32xbf16, #tpu.memory_space<vmem>>, %arg2: memref<1x32xf32, #tpu.memory_space<vmem>>, %arg3: memref<32x128xbf16, #tpu.memory_space<vmem>>, %arg4: memref<1x128xf32, #tpu.memory_space<vmem>>, %arg5: memref<8x128xf32, #tpu.memory_space<vmem>>) attributes {dimension_semantics = [], scalar_prefetch = 0 : i64, scratch_operands = 0 : i64, tpu.core_type = #tpu.core_type<tc>} {
    %c0 = arith.constant 0 : index
    %c0_0 = arith.constant 0 : index
    %0 = vector.load %arg0[%c0, %c0_0] : memref<8x16xbf16, #tpu.memory_space<vmem>>, vector<8x16xbf16>
    %c0_1 = arith.constant 0 : index
    %c0_2 = arith.constant 0 : index
    %1 = vector.load %arg1[%c0_1, %c0_2] : memref<16x32xbf16, #tpu.memory_space<vmem>>, vector<16x32xbf16>
    %cst = arith.constant dense<0.000000e+00> : vector<8x32xf32>
    %2 = tpu.matmul %0, %1, %cst {dimension_numbers = #tpu.dot_dimension_numbers<[1], [0], [0], [1], [0, 0, 1, 1], [], []>} : vector<8x16xbf16>, vector<16x32xbf16>, vector<8x32xf32> -> vector<8x32xf32>
    %c0_3 = arith.constant 0 : index
    %c0_4 = arith.constant 0 : index
    %3 = vector.load %arg2[%c0_3, %c0_4] : memref<1x32xf32, #tpu.memory_space<vmem>>, vector<1x32xf32>
    %4 = vector.broadcast %3 : vector<1x32xf32> to vector<8x32xf32>
    %5 = arith.addf %2, %4 : vector<8x32xf32>
    %cst_5 = arith.constant 0.000000e+00 : f32
    %6 = vector.broadcast %cst_5 : f32 to vector<8x32xf32>
    %7 = arith.maximumf %5, %6 : vector<8x32xf32>
    %8 = arith.truncf %7 : vector<8x32xf32> to vector<8x32xbf16>
    %c0_6 = arith.constant 0 : index
    %c0_7 = arith.constant 0 : index
    %9 = vector.load %arg3[%c0_6, %c0_7] : memref<32x128xbf16, #tpu.memory_space<vmem>>, vector<32x128xbf16>
    %cst_8 = arith.constant dense<0.000000e+00> : vector<8x128xf32>
    %10 = tpu.matmul %8, %9, %cst_8 {dimension_numbers = #tpu.dot_dimension_numbers<[1], [0], [0], [1], [0, 0, 1, 1], [], []>} : vector<8x32xbf16>, vector<32x128xbf16>, vector<8x128xf32> -> vector<8x128xf32>
    %c0_9 = arith.constant 0 : index
    %c0_10 = arith.constant 0 : index
    %11 = vector.load %arg4[%c0_9, %c0_10] : memref<1x128xf32, #tpu.memory_space<vmem>>, vector<1x128xf32>
    %12 = vector.broadcast %11 : vector<1x128xf32> to vector<8x128xf32>
    %13 = arith.addf %10, %12 : vector<8x128xf32>
    %c0_11 = arith.constant 0 : index
    %c0_12 = arith.constant 0 : index
    %14 = vector.load %arg5[%c0_11, %c0_12] : memref<8x128xf32, #tpu.memory_space<vmem>>, vector<8x128xf32>
    tpu.vector_store %arg5[%c0_11, %c0_12], %13 {strides = array<i32>} : memref<8x128xf32, #tpu.memory_space<vmem>>, vector<8x128xf32>,
    return
  }
}

</mosaic_0001>

<bundles_post_ra>
// kernel: tpu_custom_call.1
= control target key start
LH: loop header
LB: loop body
LE: loop exit
PB: predicated region body
PF: predicated region fallthrough
CT: control target
= control target key end

     0   :  { %10 = vsyncpa [#allocation3], 0  ;;  %s336_s0 = inlined_call_operand.hbm [shape: bf16[8,16], index: 0, kind: input, shape index: {}]   ;;  %s337_s1 = inlined_call_operand.hbm [shape: bf16[16,32], index: 1, kind: input, shape index: {}]   ;;  %s338_s2 = inlined_call_operand.vmem [shape: f32[1,32], index: 2, kind: input, shape index: {}]   ;;  %s339_s3 = inlined_call_operand.hbm [shape: bf16[32,128], index: 3, kind: input, shape index: {}]   ;;  %s340_s4 = inlined_call_operand.vmem [shape: f32[1,128], index: 4, kind: input, shape index: {}]   ;;  %s341_s5 = inlined_call_operand.hbm [shape: f32[8,128], index: 5, kind: output, shape index: {}]  }
   0x1   :  { %11 = vsyncpa [#allocation6], 0  ;;  %s28_s20 = sshll.u32 %s337_s1, 4  ;;  %s29_s20 = int_to_ptr.hbm [resolvable:$true] %s28_s20 }
   0x2   :  { %12 = vsyncpa [#allocation4], 0  ;;  %s282_s21 = smov [#allocation5]   ;;  %s18_s25 = sshll.u32 %s336_s0, 4  ;;  %s19_s25 = int_to_ptr.hbm [resolvable:$true] %s18_s25 }
   0x3   :  { %s30_s22 = sshll.u32 %s282_s21, 4  ;;  %s283_s26 = smov 64   ;;  %s31_s22 = int_to_ptr.vmem [resolvable:$true] %s30_s22 }
   0x4   :  { %s284_s27 = smov 4   ;;  %s285_s28 = smov [#allocation2]  }
   0x5   :  { %36 = dma.hbm_to_vmem [thread:$0]  %s29_s20, 128, %s31_s22, [#allocation6], %s283_s26, %s283_s26, %s284_s27  }
   0x6   :  { %s20_s29 = sshll.u32 %s285_s28, 4  ;;  %s43_s7 = sshll.u32 %s339_s3, 4  ;;  %s21_s29 = int_to_ptr.vmem [resolvable:$true] %s20_s29  ;;  %s44_s7 = int_to_ptr.hbm [resolvable:$true] %s43_s7 }
   0x7   :  { %23 = dma.hbm_to_vmem [thread:$0]  %s19_s25, 64, %s21_s29, [#allocation3]  }
   0x8   :  { %s286_s1 = smov [#allocation7]  }
   0x9   :  { %s45_s8 = sshll.u32 %s286_s1, 4  ;;  %s46_s8 = int_to_ptr.vmem [resolvable:$true] %s45_s8 }
   0xa   :  { %51 = dma.hbm_to_vmem [thread:$0]  %s44_s7, 256, %s46_s8, [#allocation6], %s283_s26, %s283_s26, %s284_s27  }
   0xb   :  { %276 = dma.done.wait [#allocation3], 64  }
   0xc   :  { %277 = vsyncadd [#allocation3], 4294967232 }
   0xd   :  { %278 = dma.done.wait [#allocation6], 384  }
   0xe   :  { %279 = vsyncadd [#allocation6], 4294966912  ;;  %v169_v0 = vld [vmem:[#allocation5] sm:$0xff]  ;;  %v67_v1 = vld [vmem:[#allocation2] sm:$0xf]  ;;  %vm80_vm0 = vcmask 130048  }
   0xf   :  { %91 = vmatpush.bf16.msra.mxu0 %v169_v0  ;;  %v171_v2 = vld [vmem:[#allocation7 + $0x8] sm:$0xff]  ;;  %v170_v3 = vld [vmem:[#allocation7] sm:$0xff]  ;;  %v178_v4 = vld [vmem:[%s338_s2] ss:$0 sm:$0xff]  ;;  %vm119_vm1 = vcmask 261120   ;;  %s287_s11 = smov [#allocation8]  }
  0x10   :  { %129 = vmatpush.bf16.msra.mxu1 %v171_v2  ;;  %v179_v10 = vld [vmem:[%s340_s4] ss:$0 sm:$0xff]  ;;  %s142_s12 = sshll.u32 %s287_s11, 4  ;;  %s144_s15 = sshll.u32 %s341_s5, 4  ;;  %s143_s12 = int_to_ptr.vmem [resolvable:$true] %s142_s12  ;;  %s145_s15 = int_to_ptr.hbm [resolvable:$true] %s144_s15 }
  0x12   :  { %159 = vmatmul.msk.bf16.vlgmr.msra.gmra.mxu0 %vm80_vm0, %v67_v1 }
  0x14   :  { %130 = vmatpush.bf16.msra.mxu1 %v170_v3 }
  0x8f   :  { %v93_v5 = vpop.f32.mrf.mxu0 }
  0x90   :  { %v94_v6 = vadd.f32 %v178_v4, %v93_v5 }
  0x92   :  { %v97_v7 = vmax.f32 %v94_v6, 0.0 }
  0x94   :  { %v98_v8 = vpack.c.bf16 %v97_v7, %v97_v7 }
  0x96   :  { %168 = vmatmul.msk.bf16.vlgmr.msra.gmra.mxu1 %vm119_vm1, %v98_v8 }
  0x97   :  { %v95_v9 = vpop.f32.mrf.mxu0 }
 0x113   :  { %v132_v11 = vpop.f32.mrf.mxu1 }
 0x114   :  { %v133_v12 = vadd.f32 %v179_v10, %v132_v11 }
 0x116   :  { %136 = vst [vmem:[#allocation8] sm:$0xff] %v133_v12 }
 0x117   :  { %147 = dma.vmem_to_hbm [thread:$0]  %s143_s12, 128, %s145_s15, [#allocation4]  }
 0x11b   :  { %v134_v13 = vpop.f32.mrf.mxu1 }
 0x11c   :  { %280 = dma.done.wait [#allocation4], 128  }
 0x11d   :  { %281 = vsyncadd [#allocation4], 4294967168 }
 0x11e   :  { %152 = vsyncpa [#allocation3], 1 }
 0x11f   :  { %153 = vsyncpa [#allocation6], 1 }
 0x120   :  { %154 = vsyncpa [#allocation4], 1 }

</bundles_post_ra>
